<compile_context>
chip_gen: v5e
topology: v5e:2x2
jax: 0.10.0
libtpu: 0.0.40
codegen_flags: <defaults>
</compile_context>

<pallas_src>
import jax
import jax.numpy as jnp
import numpy as np
from jax.experimental import pallas as pl
from jax.experimental.pallas import tpu as pltpu


_LANE = 128
_KG_STREAM_DTYPE = jnp.bfloat16
_KG_TILE_VMEM_BUDGET = 8 << 20   # bytes for the double-buffered kg tile stream
_MAX_TILE_N = 16384              # safe on v7x (64 MiB physical / 32 MiB scoped)


def _round_up(x, m):
    return ((x + m - 1) // m) * m


def _choose_tile_n(n_entity, d):
    """Lane-dense entity tile sized from a generation-safe VMEM budget."""
    dtype_bytes = jnp.dtype(_KG_STREAM_DTYPE).itemsize
    budget = (_KG_TILE_VMEM_BUDGET // (2 * d * dtype_bytes)) // _LANE * _LANE
    tile = min(_round_up(n_entity, _LANE), max(budget, _LANE), _MAX_TILE_N)
    return max(tile, _LANE)


# ----------------------------------------------------------------------------
# Kernel 1 (one-shot prologue, no grid):
#   token_rep = linear_transformation(cls_hidden)
#   ent_rep   = SelfDotAttention(entity_reps, entity_mask)
#   gate      = sigmoid(W_g . [token_rep, ent_rep])
#   user      = gate * token_rep + (1-gate) * ent_rep      (stored bf16)
# (dropout_ft is identity at inference time)
# ----------------------------------------------------------------------------
def _user_embedding_kernel(cls_ref, ent_ref, mask_ref,
                           wlt_ref, blt_ref, wa_ref, wb_ref,
                           wg_tok_ref, wg_ent_ref, bg_ref,
                           user_ref):
    cls_h = cls_ref[...]                                               # (B, H)
    token_rep = (jnp.dot(cls_h, wlt_ref[...],
                         preferred_element_type=jnp.float32)
                 + blt_ref[...])                                       # (B, D)

    ent = ent_ref[...]                                                 # (B, N, D)
    B, N, D = ent.shape
    # SelfDotAttention: attn = softmax( tanh(h @ A) . b ), pad-masked.
    # One 2-D MXU matmul over the flattened (B*N, D) rows.
    e = jnp.tanh(jnp.dot(ent.reshape(B * N, D), wa_ref[...],
                         preferred_element_type=jnp.float32))          # (B*N, D)
    # Kept as a VPU multiply + lane-reduce: this prologue runs once per call;
    # the streaming phase below is the HBM-bound bottleneck.
    logits = jnp.sum(e.reshape(B, N, D) * wb_ref[...], axis=-1)        # (B, N)
    mask = mask_ref[...]                                               # (B, N) 1.0 = valid
    # NOTE: a row with all-padding entities yields a uniform softmax over pads,
    # matching the torch reference semantics (model-level quirk, not kernel).
    logits = jnp.where(mask > 0.5, logits, -1e30)
    logits = logits - jnp.max(logits, axis=-1, keepdims=True)
    p = jnp.exp(logits)
    p = p / jnp.sum(p, axis=-1, keepdims=True)                         # softmax
    ent_rep = jnp.sum(p[:, :, None] * ent, axis=1)                     # (B, D)

    # gating over concat([token_rep, ent_rep]) with pre-split weight halves
    gate = jax.nn.sigmoid(
        jnp.dot(token_rep, wg_tok_ref[...], preferred_element_type=jnp.float32)
        + jnp.dot(ent_rep, wg_ent_ref[...], preferred_element_type=jnp.float32)
        + bg_ref[...])
    user = gate * token_rep + (1.0 - gate) * ent_rep
    user_ref[...] = user.astype(user_ref.dtype)                        # bf16 for the stream


# ----------------------------------------------------------------------------
# Kernel 2 (streaming phase, grid over entity tiles, "parallel"):
#   scores[:, tile j] = user @ kg_tile_j        (bf16 x bf16 -> f32 accumulate)
# ----------------------------------------------------------------------------
def _scores_kernel(user_ref, kg_ref, scores_ref):
    scores_ref[...] = jnp.dot(user_ref[...], kg_ref[...],
                              preferred_element_type=jnp.float32)


# ----------------------------------------------------------------------------
# One-time parameter layout prep (hoisted out of the per-call path)
# ----------------------------------------------------------------------------
def prepare_params(raw):
    kg = raw["kg_embedding"]                            # (n_entity, D) f32
    n_entity, d = kg.shape
    tile_n = _choose_tile_n(n_entity, d)
    n_pad = _round_up(n_entity, tile_n)
    kg_t = kg.T.astype(_KG_STREAM_DTYPE)                # (D, n_entity) bf16
    if n_pad != n_entity:
        kg_t = jnp.pad(kg_t, ((0, 0), (0, n_pad - n_entity)))
    # (n_tiles, D, tile_n): one contiguous, lane-dense block per grid step.
    kg_tiled = kg_t.reshape(d, n_pad // tile_n, tile_n).transpose(1, 0, 2)

    w_g = raw["w_g"]
    prepared = dict(raw)
    prepared["kg_tiled"] = kg_tiled
    prepared["w_g_tok"] = w_g[:d, :]
    prepared["w_g_ent"] = w_g[d:, :]
    return prepared


# ----------------------------------------------------------------------------
# Wrapper (plain-JAX glue: embedding lookups / gathers / pallas_call plumbing)
# ----------------------------------------------------------------------------
@jax.jit
def movie_expert_crs_forward(params, context_entities, context_tokens):
    kg_emb = params["kg_embedding"]                     # (n_entity, D) f32 gather table
    n_entity, D = kg_emb.shape

    # TODO(synk): real model runs a BERT word_encoder here; replaced with a
    # deterministic embedding lookup standing in for last_hidden_state.
    token_hidden = params["word_encoder_embedding"][context_tokens]   # (B, S, H)
    # word_encoder == 0 path: token_attn_rep = linear_transformation(emb)[:, 0, :]
    cls_hidden = token_hidden[:, 0, :]                  # (B, H)

    # TODO(synk): real model computes kg_embedding with an RGCNConv over the
    # entity KG (torch_geometric); replaced with a static entity table (which
    # is also what makes the init-time kg pre-tiling valid).
    entity_reps = kg_emb[context_entities]              # (B, N, D)
    entity_mask = (context_entities != 0).astype(jnp.float32)   # ~eq(pad_entity_idx)

    B = cls_hidden.shape[0]
    H = cls_hidden.shape[-1]

    # --- one-shot prologue: user embedding. Kept out of the streaming kernel
    #     so the entity grid axis below carries no scratch dependency and can
    #     be split across TensorCores on v7x. ---
    user_bf16 = pl.pallas_call(
        _user_embedding_kernel,
        out_shape=jax.ShapeDtypeStruct((B, D), jnp.bfloat16),
    )(cls_hidden, entity_reps, entity_mask,
      params["w_lt"], params["b_lt"], params["w_a"], params["w_b"],
      params["w_g_tok"], params["w_g_ent"], params["b_g"])

    # --- streaming phase: scores = user @ kg^T over lane-dense entity tiles ---
    kg_tiled = params["kg_tiled"]                       # (n_tiles, D, tile_n) bf16
    n_tiles, _, tile_n = kg_tiled.shape
    n_pad = n_tiles * tile_n

    kg_bytes = jnp.dtype(_KG_STREAM_DTYPE).itemsize
    # double-buffered kg tile + double-buffered f32 out tile + invariant user
    vmem_need = 2 * D * tile_n * kg_bytes + 2 * B * tile_n * 4 + B * D * 2
    vmem_limit = int(min(max(2 * vmem_need, 16 << 20), 32 << 20))

    scores_pad = pl.pallas_call(
        _scores_kernel,
        out_shape=jax.ShapeDtypeStruct((B, n_pad), jnp.float32),
        grid=(n_tiles,),
        in_specs=[
            pl.BlockSpec((B, D), lambda j: (0, 0)),                # grid-invariant user
            pl.BlockSpec((None, D, tile_n), lambda j: (j, 0, 0)),  # contiguous kg tile
        ],
        out_specs=pl.BlockSpec((B, tile_n), lambda j: (0, j)),
        compiler_params=pltpu.CompilerParams(
            # No cross-step dependency -> runtime may shard tiles over both
            # TensorCores on v7x; neutral on single-TC v5e/v6e.
            dimension_semantics=("parallel",),
            vmem_limit_bytes=vmem_limit),
        cost_estimate=pl.CostEstimate(
            flops=2 * B * D * n_pad,
            transcendentals=0,
            bytes_accessed=D * n_pad * kg_bytes + B * D * 2 + B * n_pad * 4),
        # TODO(synk): sweep pipeline_mode=pl.Buffered(3) on the kg spec after
        # confirming exposed DMA in a bundle dump; consider padding B up to 8.
    )(user_bf16, kg_tiled)

    return scores_pad[:, :n_entity]


# ----------------------------------------------------------------------------
# Deterministic parameter init (shapes per MovieExpertCRS.__init__)
# ----------------------------------------------------------------------------
def init_params(key, n_entity, kg_dim, token_dim, vocab_size):
    ks = jax.random.split(key, 8)

    def xavier(k, shape):
        limit = (6.0 / (shape[0] + shape[1])) ** 0.5
        return jax.random.uniform(k, shape, jnp.float32, -limit, limit)

    raw = {
        # stand-in for RGCNConv(n_entity, kg_emb_dim, ...) output
        "kg_embedding": 0.1 * jax.random.normal(ks[0], (n_entity, kg_dim), jnp.float32),
        # stand-in for BERT word encoder hidden states
        "word_encoder_embedding": 0.02 * jax.random.normal(
            ks[1], (vocab_size, token_dim), jnp.float32),
        # linear_transformation: nn.Linear(token_emb_dim, kg_emb_dim)
        "w_lt": xavier(ks[2], (token_dim, kg_dim)),
        "b_lt": jnp.zeros((1, kg_dim), jnp.float32),
        # entity_attention = SelfDotAttention(kg_dim, kg_dim): A (D,D), b (1,D)
        "w_a": xavier(ks[3], (kg_dim, kg_dim)),
        "w_b": xavier(ks[4], (1, kg_dim)),
        # gating: nn.Linear(2*kg_dim, kg_dim)
        "w_g": xavier(ks[5], (2 * kg_dim, kg_dim)),
        "b_g": jnp.zeros((1, kg_dim), jnp.float32),
    }
    return prepare_params(raw)


# ----------------------------------------------------------------------------
# Pure-jnp reference of the same forward (for a correctness check)
# ----------------------------------------------------------------------------
def reference_forward(params, context_entities, context_tokens):
    kg_emb = params["kg_embedding"]
    token_hidden = params["word_encoder_embedding"][context_tokens]
    cls_hidden = token_hidden[:, 0, :]
    entity_reps = kg_emb[context_entities]
    mask = (context_entities != 0)

    token_rep = cls_hidden @ params["w_lt"] + params["b_lt"][0]
    e = jnp.tanh(jnp.einsum('bnd,de->bne', entity_reps, params["w_a"]))
    logits = jnp.sum(e * params["w_b"], axis=-1)
    logits = jnp.where(mask, logits, -1e30)
    p = jax.nn.softmax(logits, axis=-1)
    ent_rep = jnp.einsum('bn,bnd->bd', p, entity_reps)
    cat = jnp.concatenate([token_rep, ent_rep], axis=-1)
    gate = jax.nn.sigmoid(cat @ params["w_g"] + params["b_g"][0])
    user = gate * token_rep + (1.0 - gate) * ent_rep
    return user @ kg_emb.T


if __name__ == "__main__":
    key = jax.random.PRNGKey(0)
    B, S, N_CTX = 2, 8, 8
    N_ENTITY, KG_DIM, TOKEN_DIM, VOCAB = 256, 32, 64, 100

    kp, ke, kt = jax.random.split(key, 3)
    params = init_params(kp, N_ENTITY, KG_DIM, TOKEN_DIM, VOCAB)

    context_entities = jax.random.randint(ke, (B, N_CTX), 0, N_ENTITY, dtype=jnp.int32)
    context_entities = context_entities.at[:, 0].set(1)   # ensure >=1 non-pad entity
    context_tokens = jax.random.randint(kt, (B, S), 1, VOCAB, dtype=jnp.int32)

    scores = movie_expert_crs_forward(params, context_entities, context_tokens)
    scores = jax.block_until_ready(scores)

    ref = reference_forward(params, context_entities, context_tokens)
    assert scores.shape == (B, N_ENTITY)
    # Tolerance loosened vs the f32 reference because the kg/user stream is
    # bf16 (accumulation stays f32 via preferred_element_type).
    np.testing.assert_allclose(np.asarray(scores), np.asarray(ref),
                               rtol=2e-2, atol=2e-3)
    print("KERNEL_OK")
</pallas_src>

<mosaic_0001>
module attributes {stable_mosaic.version = 11 : i64} {
  func.func @_user_embedding_kernel(%arg0: memref<2x64xf32, #tpu.memory_space<vmem>>, %arg1: memref<2x8x32xf32, #tpu.memory_space<vmem>>, %arg2: memref<2x8xf32, #tpu.memory_space<vmem>>, %arg3: memref<64x32xf32, #tpu.memory_space<vmem>>, %arg4: memref<1x32xf32, #tpu.memory_space<vmem>>, %arg5: memref<32x32xf32, #tpu.memory_space<vmem>>, %arg6: memref<1x32xf32, #tpu.memory_space<vmem>>, %arg7: memref<32x32xf32, #tpu.memory_space<vmem>>, %arg8: memref<32x32xf32, #tpu.memory_space<vmem>>, %arg9: memref<1x32xf32, #tpu.memory_space<vmem>>, %arg10: memref<2x32xbf16, #tpu.memory_space<vmem>>) attributes {dimension_semantics = [], scalar_prefetch = 0 : i64, scratch_operands = 0 : i64, tpu.core_type = #tpu.core_type<tc>} {
    %c0 = arith.constant 0 : index
    %c0_0 = arith.constant 0 : index
    %0 = vector.load %arg0[%c0, %c0_0] : memref<2x64xf32, #tpu.memory_space<vmem>>, vector<2x64xf32>
    %c0_1 = arith.constant 0 : index
    %c0_2 = arith.constant 0 : index
    %1 = vector.load %arg3[%c0_1, %c0_2] : memref<64x32xf32, #tpu.memory_space<vmem>>, vector<64x32xf32>
    %cst = arith.constant dense<0.000000e+00> : vector<2x32xf32>
    %2 = tpu.matmul %0, %1, %cst {dimension_numbers = #tpu.dot_dimension_numbers<[1], [0], [0], [1], [0, 0, 1, 1], [], []>} : vector<2x64xf32>, vector<64x32xf32>, vector<2x32xf32> -> vector<2x32xf32>
    %c0_3 = arith.constant 0 : index
    %c0_4 = arith.constant 0 : index
    %3 = vector.load %arg4[%c0_3, %c0_4] : memref<1x32xf32, #tpu.memory_space<vmem>>, vector<1x32xf32>
    %4 = vector.broadcast %3 : vector<1x32xf32> to vector<2x32xf32>
    %5 = arith.addf %2, %4 : vector<2x32xf32>
    %c0_5 = arith.constant 0 : index
    %c0_6 = arith.constant 0 : index
    %c0_7 = arith.constant 0 : index
    %6 = vector.load %arg1[%c0_5, %c0_6, %c0_7] : memref<2x8x32xf32, #tpu.memory_space<vmem>>, vector<2x8x32xf32>
    %7 = vector.shape_cast %6 : vector<2x8x32xf32> to vector<16x32xf32>
    %c0_8 = arith.constant 0 : index
    %c0_9 = arith.constant 0 : index
    %8 = vector.load %arg5[%c0_8, %c0_9] : memref<32x32xf32, #tpu.memory_space<vmem>>, vector<32x32xf32>
    %cst_10 = arith.constant dense<0.000000e+00> : vector<16x32xf32>
    %9 = tpu.matmul %7, %8, %cst_10 {dimension_numbers = #tpu.dot_dimension_numbers<[1], [0], [0], [1], [0, 0, 1, 1], [], []>} : vector<16x32xf32>, vector<32x32xf32>, vector<16x32xf32> -> vector<16x32xf32>
    %10 = math.tanh %9 : vector<16x32xf32>
    %11 = vector.shape_cast %10 : vector<16x32xf32> to vector<2x8x32xf32>
    %c0_11 = arith.constant 0 : index
    %c0_12 = arith.constant 0 : index
    %12 = vector.load %arg6[%c0_11, %c0_12] : memref<1x32xf32, #tpu.memory_space<vmem>>, vector<1x32xf32>
    %13 = vector.shape_cast %12 : vector<1x32xf32> to vector<1x1x32xf32>
    %14 = vector.broadcast %13 : vector<1x1x32xf32> to vector<2x8x32xf32>
    %15 = arith.mulf %11, %14 : vector<2x8x32xf32>
    %cst_13 = arith.constant dense<0.000000e+00> : vector<2x8xf32>
    %16 = vector.multi_reduction <add>, %15, %cst_13 [2] : vector<2x8x32xf32> to vector<2x8xf32>
    %c0_14 = arith.constant 0 : index
    %c0_15 = arith.constant 0 : index
    %17 = vector.load %arg2[%c0_14, %c0_15] : memref<2x8xf32, #tpu.memory_space<vmem>>, vector<2x8xf32>
    %cst_16 = arith.constant 5.000000e-01 : f32
    %18 = vector.broadcast %cst_16 : f32 to vector<2x8xf32>
    %19 = arith.cmpf ogt, %17, %18 : vector<2x8xf32>
    %cst_17 = arith.constant -1.000000e+30 : f32
    %20 = vector.broadcast %cst_17 : f32 to vector<2x8xf32>
    %21 = arith.select %19, %16, %20 : vector<2x8xi1>, vector<2x8xf32>
    %cst_18 = arith.constant dense<0xFF800000> : vector<2xf32>
    %22 = vector.multi_reduction <maximumf>, %21, %cst_18 [1] : vector<2x8xf32> to vector<2xf32>
    %23 = vector.shape_cast %22 : vector<2xf32> to vector<2x1xf32>
    %24 = vector.broadcast %23 : vector<2x1xf32> to vector<2x8xf32>
    %25 = arith.subf %21, %24 : vector<2x8xf32>
    %26 = math.exp %25 : vector<2x8xf32>
    %cst_19 = arith.constant dense<0.000000e+00> : vector<2xf32>
    %27 = vector.multi_reduction <add>, %26, %cst_19 [1] : vector<2x8xf32> to vector<2xf32>
    %28 = vector.shape_cast %27 : vector<2xf32> to vector<2x1xf32>
    %29 = vector.broadcast %28 : vector<2x1xf32> to vector<2x8xf32>
    %30 = arith.divf %26, %29 : vector<2x8xf32>
    %31 = vector.shape_cast %30 : vector<2x8xf32> to vector<2x8x1xf32>
    %32 = vector.broadcast %31 : vector<2x8x1xf32> to vector<2x8x32xf32>
    %33 = arith.mulf %32, %6 : vector<2x8x32xf32>
    %cst_20 = arith.constant dense<0.000000e+00> : vector<2x32xf32>
    %34 = vector.multi_reduction <add>, %33, %cst_20 [1] : vector<2x8x32xf32> to vector<2x32xf32>
    %c0_21 = arith.constant 0 : index
    %c0_22 = arith.constant 0 : index
    %35 = vector.load %arg7[%c0_21, %c0_22] : memref<32x32xf32, #tpu.memory_space<vmem>>, vector<32x32xf32>
    %cst_23 = arith.constant dense<0.000000e+00> : vector<2x32xf32>
    %36 = tpu.matmul %5, %35, %cst_23 {dimension_numbers = #tpu.dot_dimension_numbers<[1], [0], [0], [1], [0, 0, 1, 1], [], []>} : vector<2x32xf32>, vector<32x32xf32>, vector<2x32xf32> -> vector<2x32xf32>
    %c0_24 = arith.constant 0 : index
    %c0_25 = arith.constant 0 : index
    %37 = vector.load %arg8[%c0_24, %c0_25] : memref<32x32xf32, #tpu.memory_space<vmem>>, vector<32x32xf32>
    %cst_26 = arith.constant dense<0.000000e+00> : vector<2x32xf32>
    %38 = tpu.matmul %34, %37, %cst_26 {dimension_numbers = #tpu.dot_dimension_numbers<[1], [0], [0], [1], [0, 0, 1, 1], [], []>} : vector<2x32xf32>, vector<32x32xf32>, vector<2x32xf32> -> vector<2x32xf32>
    %39 = arith.addf %36, %38 : vector<2x32xf32>
    %c0_27 = arith.constant 0 : index
    %c0_28 = arith.constant 0 : index
    %40 = vector.load %arg9[%c0_27, %c0_28] : memref<1x32xf32, #tpu.memory_space<vmem>>, vector<1x32xf32>
    %41 = vector.broadcast %40 : vector<1x32xf32> to vector<2x32xf32>
    %42 = arith.addf %39, %41 : vector<2x32xf32>
    %43 = arith.negf %42 : vector<2x32xf32>
    %44 = math.exp %43 : vector<2x32xf32>
    %cst_29 = arith.constant 1.000000e+00 : f32
    %45 = vector.broadcast %cst_29 : f32 to vector<2x32xf32>
    %46 = arith.addf %45, %44 : vector<2x32xf32>
    %47 = arith.divf %45, %46 : vector<2x32xf32>
    %48 = arith.mulf %47, %5 : vector<2x32xf32>
    %cst_30 = arith.constant 1.000000e+00 : f32
    %49 = vector.broadcast %cst_30 : f32 to vector<2x32xf32>
    %50 = arith.subf %49, %47 : vector<2x32xf32>
    %51 = arith.mulf %50, %34 : vector<2x32xf32>
    %52 = arith.addf %48, %51 : vector<2x32xf32>
    %53 = arith.truncf %52 : vector<2x32xf32> to vector<2x32xbf16>
    %c0_31 = arith.constant 0 : index
    %c0_32 = arith.constant 0 : index
    %54 = vector.load %arg10[%c0_31, %c0_32] : memref<2x32xbf16, #tpu.memory_space<vmem>>, vector<2x32xbf16>
    tpu.vector_store %arg10[%c0_31, %c0_32], %53 {strides = array<i32>} : memref<2x32xbf16, #tpu.memory_space<vmem>>, vector<2x32xbf16>,
    return
  }
}

module attributes {stable_mosaic.version = 11 : i64} {
  func.func @_scores_kernel(%arg0: i32, %arg1: memref<2x32xbf16, #tpu.memory_space<vmem>>, %arg2: memref<1x32x256xbf16, #tpu.memory_space<vmem>>, %arg3: memref<2x256xf32, #tpu.memory_space<vmem>>) attributes {dimension_semantics = [#tpu.dimension_semantics<parallel>], iteration_bounds = array<i64: 1>, scalar_prefetch = 0 : i64, scratch_operands = 0 : i64, tpu.core_type = #tpu.core_type<tc>, window_params = [{pipeline_mode = #tpu.pipeline_mode<synchronous>, transform_indices = @transform_0, window_bounds = array<i64: 2, 32>}, {transform_indices = @transform_1, window_bounds = array<i64: 1, 32, 256>}, {transform_indices = @transform_2, window_bounds = array<i64: 2, 256>}]} {
    %c0 = arith.constant 0 : index
    %c0_0 = arith.constant 0 : index
    %0 = vector.load %arg1[%c0, %c0_0] : memref<2x32xbf16, #tpu.memory_space<vmem>>, vector<2x32xbf16>
    %c0_1 = arith.constant 0 : index
    %c0_2 = arith.constant 0 : index
    %c0_3 = arith.constant 0 : index
    %1 = vector.load %arg2[%c0_1, %c0_2, %c0_3] : memref<1x32x256xbf16, #tpu.memory_space<vmem>>, vector<1x32x256xbf16>
    %2 = vector.shape_cast %1 : vector<1x32x256xbf16> to vector<32x256xbf16>
    %cst = arith.constant dense<0.000000e+00> : vector<2x256xf32>
    %3 = tpu.matmul %0, %2, %cst {dimension_numbers = #tpu.dot_dimension_numbers<[1], [0], [0], [1], [0, 0, 1, 1], [], []>} : vector<2x32xbf16>, vector<32x256xbf16>, vector<2x256xf32> -> vector<2x256xf32>
    %c0_4 = arith.constant 0 : index
    %c0_5 = arith.constant 0 : index
    %4 = vector.load %arg3[%c0_4, %c0_5] : memref<2x256xf32, #tpu.memory_space<vmem>>, vector<2x256xf32>
    tpu.vector_store %arg3[%c0_4, %c0_5], %3 {strides = array<i32>} : memref<2x256xf32, #tpu.memory_space<vmem>>, vector<2x256xf32>,
    return
  }
  func.func @transform_0(%arg0: i32) -> (i32, i32) {
    %c0_i32 = arith.constant 0 : i32
    %c0_i32_0 = arith.constant 0 : i32
    %c0_i32_1 = arith.constant 0 : i32
    return %c0_i32, %c0_i32_0 : i32, i32
  }
  func.func @transform_1(%arg0: i32) -> (i32, i32, i32) {
    %c0_i32 = arith.constant 0 : i32
    %c0_i32_0 = arith.constant 0 : i32
    %c0_i32_1 = arith.constant 0 : i32
    return %arg0, %c0_i32, %c0_i32_0 : i32, i32, i32
  }
  func.func @transform_2(%arg0: i32) -> (i32, i32) {
    %c0_i32 = arith.constant 0 : i32
    %c0_i32_0 = arith.constant 0 : i32
    return %c0_i32, %arg0 : i32, i32
  }
}

</mosaic_0001>

<bundles_post_ra>
// kernel: movie_expert_crs_forward.3
= control target key start
LH: loop header
LB: loop body
LE: loop exit
PB: predicated region body
PF: predicated region fallthrough
CT: control target
= control target key end

     0   :  { %s186_s0 = inlined_call_operand.vmem [shape: bf16[2,32], index: 0, kind: input, shape index: {}]   ;;  %s187_s1 = inlined_call_operand.vmem [shape: bf16[1,32,256], index: 1, kind: input, shape index: {}]   ;;  %s188_s2 = inlined_call_operand.hbm [shape: f32[2,256], index: 2, kind: output, shape index: {}]  }
   0x1   :  { %v101_v0 = vld [vmem:[%s187_s1 + $0x10] sm:$0xf]  ;;  %v112_v1 = vld [vmem:[%s187_s1 + $0x14] sm:$0xf0]  ;;  %v111_v2 = vld [vmem:[%s187_s1 + $0x14] sm:$0xf] }
   0x2   :  { %v102_v3 = vor.u32 %v112_v1, %v101_v0  ;;  %v103_v4 = vld [vmem:[%s187_s1 + $0x18] sm:$0xf0]  ;;  %v93_v5 = vld [vmem:[%s187_s1] sm:$0xf]  ;;  %v110_v6 = vld [vmem:[%s187_s1 + $0x4] sm:$0xf0] }
   0x3   :  { %v106_v7 = vor.u32 %v111_v2, %v103_v4  ;;  %v109_v8 = vld [vmem:[%s187_s1 + $0x4] sm:$0xf]  ;;  %v95_v9 = vld [vmem:[%s187_s1 + $0x8] sm:$0xf0]  ;;  %v94_v10 = vor.u32 %v110_v6, %v93_v5 }
   0x4   :  { %48 = vmatpush.bf16.msra.mxu0 %v102_v3 }
   0x5   :  { %7 = vsyncpa [#allocation3], 0  ;;  %61 = vmatpush.bf16.msra.mxu1 %v106_v7  ;;  %v98_v11 = vor.u32 %v109_v8, %v95_v9  ;;  %v13_v12 = vld [vmem:[%s186_s0] sm:$0x1]  ;;  %vm38_vm0 = vcmask 261120   ;;  %s140_s27 = smov [#allocation2]  }
   0x6   :  { %s80_s28 = sshll.u32 %s140_s27, 4  ;;  %s82_s1 = sshll.u32 %s188_s2, 4  ;;  %vm71_vm1 = vcmask 1041408   ;;  %s81_s28 = int_to_ptr.vmem [resolvable:$true] %s80_s28  ;;  %s83_s1 = int_to_ptr.hbm [resolvable:$true] %s82_s1 }
   0x8   :  { %49 = vmatpush.bf16.msra.mxu0 %v94_v10 }
   0x9   :  { %62 = vmatpush.bf16.msra.mxu1 %v98_v11 }
   0xb   :  { %107 = vmatmul.msk.bf16.vlgmr.msra.gmra.mxu0 %vm38_vm0, %v13_v12 }
   0xc   :  { %108 = vmatmul.msk.bf16.vlgmr.msra.gmra.mxu1 %vm38_vm0, %v13_v12 }
  0x88   :  { %v51_v13 = vpop.f32.mrf.mxu0 }
  0x89   :  { %v64_v14 = vpop.f32.mrf.mxu1 }
  0x8a   :  { %v70_v15 = vrot.slane %v64_v14, 6 }
  0x8c   :  { %v72_v16 = vsel %vm71_vm1, %v51_v13, %v70_v15 }
  0x8d   :  { %74 = vst [vmem:[#allocation2] sm:$0xf] %v72_v16 }
  0x8e   :  { %85 = dma.vmem_to_hbm [thread:$0]  %s81_s28, 64, %s83_s1, [#allocation3]  }
  0x90   :  { %v53_v17 = vpop.f32.mrf.mxu0 }
  0x91   :  { %v66_v18 = vpop.f32.mrf.mxu1 }
  0x92   :  { %138 = dma.done.wait [#allocation3], 64  }
  0x93   :  { %139 = vsyncadd [#allocation3], 4294967232 }
  0x94   :  { %90 = vsyncpa [#allocation3], 1 }

// kernel: movie_expert_crs_forward.2
= control target key start
LH: loop header
LB: loop body
LE: loop exit
PB: predicated region body
PF: predicated region fallthrough
CT: control target
= control target key end

     0   :  { %vm78_vm0 = vcmask 261120   ;;  %v126_v16 = vlaneseq  ;;  %vm130_vm1 = vcmask 1041409   ;;  %vm134_vm3 = vcmask 58368   ;;  %s463_s5 = inlined_call_operand.vmem [shape: f32[32,32], index: 5, kind: input, shape index: {}]   ;;  %s464_s1 = inlined_call_operand.vmem [shape: f32[2,8,32], index: 1, kind: input, shape index: {}]   ;;  %s465_s6 = inlined_call_operand.vmem [shape: f32[1,32], index: 6, kind: input, shape index: {}]   ;;  %s466_s2 = inlined_call_operand.vmem [shape: f32[2,8], index: 2, kind: input, shape index: {}]   ;;  %s467_s3 = inlined_call_operand.vmem [shape: f32[64,32], index: 3, kind: input, shape index: {}]   ;;  %s468_s0 = inlined_call_operand.vmem [shape: f32[2,64], index: 0, kind: input, shape index: {}]   ;;  %s469_s4 = inlined_call_operand.vmem [shape: f32[1,32], index: 4, kind: input, shape index: {}]   ;;  %s470_s8 = inlined_call_operand.vmem [shape: f32[32,32], index: 8, kind: input, shape index: {}]   ;;  %s471_s7 = inlined_call_operand.vmem [shape: f32[32,32], index: 7, kind: input, shape index: {}]   ;;  %s472_s9 = inlined_call_operand.vmem [shape: f32[1,32], index: 9, kind: input, shape index: {}]   ;;  %s473_s10 = inlined_call_operand.vmem [shape: bf16[2,32], index: 10, kind: output, shape index: {}]  }
   0x1   :  { %v77_v0 = vld [vmem:[%s463_s5 + $0x18] sm:$0xff]  ;;  %v76_v1 = vld [vmem:[%s463_s5 + $0x10] sm:$0xff]  ;;  %v75_v2 = vld [vmem:[%s463_s5 + $0x8] sm:$0xff]  ;;  %vm48_vm4 = vcmask 523264   ;;  %vm275_vm13 = vcmask 253952  }
   0x2   :  { %97 = vmatpush.msra.mxu1 %v77_v0  ;;  %v74_v3 = vld [vmem:[%s463_s5] sm:$0xff]  ;;  %v381_v5 = vld [vmem:[%s464_s1 + $0x8] sm:$0xff]  ;;  %v127_v17 = vand.u32 127, %v126_v16  ;;  %v43_v25 = vld [vmem:[%s467_s3 + $0x38] sm:$0xff]  ;;  %v161_v39 = vshrl.u32 %v126_v16, 7 }
   0x3   :  { %v374_v4 = vld [vmem:[%s464_s1] sm:$0xff]  ;;  %v42_v26 = vld [vmem:[%s467_s3 + $0x30] sm:$0xff]  ;;  %60 = vmatpush.msra.mxu0 %v43_v25  ;;  %v41_v27 = vld [vmem:[%s467_s3 + $0x28] sm:$0xff] }
   0x4   :  { %98 = vmatpush.msra.mxu1 %v76_v1  ;;  %v289_v7 = vld [vmem:[%s465_s6] ss:$0 sm:$0xff]  ;;  %v39_v34 = vld [vmem:[%s467_s3 + $0x18] sm:$0xff]  ;;  %v38_v35 = vld [vmem:[%s467_s3 + $0x10] sm:$0xff]  ;;  %287 = vset.pattern.permute.xlu2 %v161_v39 }
   0x5   :  { %v122_v18 = vld [vmem:[%s466_s2] sm:$0x3]  ;;  %61 = vmatpush.msra.mxu0 %v42_v26  ;;  %v37_v36 = vld [vmem:[%s467_s3 + $0x8] sm:$0xff]  ;;  %288 = vset.pattern.permute.xlu0 %v161_v39  ;;  %v196_v54 = vld [vmem:[%s470_s8 + $0x18] sm:$0xff] }
   0x6   :  { %99 = vmatpush.msra.mxu1 %v75_v2  ;;  %vm123_vm2 = vcmp.gt.f32.partialorder %v122_v18, 0.5  ;;  %v40_v28 = vld [vmem:[%s467_s3 + $0x20] sm:$0xff]  ;;  %v192_v55 = vld [vmem:[%s471_s7 + $0x18] sm:$0xff]  ;;  %214 = vmatpush.msra.mxu2 %v196_v54  ;;  %v195_v56 = vld [vmem:[%s470_s8 + $0x10] sm:$0xff] }
   0x7   :  { %62 = vmatpush.msra.mxu0 %v41_v27  ;;  %v36_v37 = vld [vmem:[%s467_s3] sm:$0xff]  ;;  %237 = vmatpush.msra.mxu3 %v192_v55  ;;  %v191_v57 = vld [vmem:[%s471_s7 + $0x10] sm:$0xff]  ;;  %v194_v59 = vld [vmem:[%s470_s8 + $0x8] sm:$0xff] }
   0x8   :  { %100 = vmatpush.msra.mxu1 %v74_v3  ;;  %v35_v38 = vld [vmem:[%s468_s0] sm:$0x3]  ;;  %215 = vmatpush.msra.mxu2 %v195_v56  ;;  %v190_v60 = vld [vmem:[%s471_s7 + $0x8] sm:$0xff] }
   0x9   :  { %282 = vmatmul.msk.f32.vlgmr.msra.gmra.mxu1 %vm78_vm0, %v374_v4  ;;  %63 = vmatpush.msra.mxu0 %v40_v28  ;;  %v290_v58 = vld [vmem:[%s469_s4] ss:$0 sm:$0xff] }
   0xa   :  { %238 = vmatpush.msra.mxu3 %v191_v57  ;;  %v193_v61 = vld [vmem:[%s470_s8] sm:$0xff]  ;;  %216 = vmatpush.msra.mxu2 %v194_v59 }
   0xb   :  { %64 = vmatpush.msra.mxu0 %v39_v34  ;;  %v189_v62 = vld [vmem:[%s471_s7] sm:$0xff] }
   0xc   :  { %239 = vmatpush.msra.mxu3 %v190_v60  ;;  %217 = vmatpush.msra.mxu2 %v193_v61 }
   0xd   :  { %65 = vmatpush.msra.mxu0 %v38_v35 }
   0xe   :  { %240 = vmatpush.msra.mxu3 %v189_v62 }
   0xf   :  { %66 = vmatpush.msra.mxu0 %v37_v36 }
  0x11   :  { %283 = vmatmul.msk.f32.gmra.mxu1 %vm78_vm0, %v381_v5  ;;  %67 = vmatpush.msra.mxu0 %v36_v37 }
  0x12   :  { %281 = vmatmul.msk.f32.vlgmr.msra.gmra.mxu0 %vm48_vm4, %v35_v38 }
  0x86   :  { %v102_v6 = vpop.f32.mrf.mxu1 }
  0x87   :  { %292 = vtanh.f32 %v102_v6 }
  0x8d   :  { %v293_v8 = vpop.eup %292 }
  0x8e   :  { %v105_v9 = vpop.f32.mrf.mxu1  ;;  %v114_v10 = vmul.f32 %v293_v8, %v289_v7 }
  0x8f   :  { %294 = vtanh.f32 %v105_v9  ;;  %v69_v63 = vpop.f32.mrf.mxu0 }
  0x90   :  { %v116_v11 = vsel %vm78_vm0, %v114_v10, 0.0  ;;  %v70_v0 = vadd.f32 %v290_v58, %v69_v63 }
  0x91   :  { %117 = vadd.xlane.f32.xlu0 %v116_v11 }
  0x92   :  { %285 = vmatmul.msk.f32.vlgmr.msra.gmra.mxu3 %vm78_vm0, %v70_v0 }
  0x95   :  { %v295_v12 = vpop.eup %294 }
  0x96   :  { %v115_v13 = vmul.f32 %v295_v12, %v289_v7 }
  0x98   :  { %v119_v14 = vsel %vm78_vm0, %v115_v13, 0.0 }
  0x99   :  { %120 = vadd.xlane.f32.xlu0 %v119_v14 }
 0x104   :  { %v118_v15 = vpop.xlane.xlu0 %117 }
 0x105   :  { %v128_v20 = vperm.slane %v118_v15, %v127_v17 }
 0x10c   :  { %v121_v19 = vpop.xlane.xlu0 %120 }
 0x10d   :  { %v129_v21 = vperm.slane %v121_v19, %v127_v17 }
 0x10f   :  { %v131_v22 = vsel %vm130_vm1, %v129_v21, %v128_v20 }
 0x110   :  { %v133_v23 = vsel %vm123_vm2, %v131_v22, -1e+30 }
 0x111   :  { %v135_v24 = vsel %vm134_vm3, %v133_v23, -inf }
 0x112   :  { %136 = vmax.xlane.f32.xlu1 %v135_v24 }
 0x115   :  { %v242_v21 = vpop.f32.mrf.mxu3 }
 0x185   :  { %v137_v29 = vpop.xlane.xlu1 %136 }
 0x186   :  { %v138_v30 = vsub.f32 %v133_v23, %v137_v29 }
 0x188   :  { %v139_v31 = vmul.f32 1.442695, %v138_v30 }
 0x18a   :  { %296 = vpow2.f32 %v139_v31 }
 0x190   :  { %v297_v32 = vpop.eup %296 }
 0x191   :  { %v141_v33 = vsel %vm134_vm3, %v297_v32, 0.0 }
 0x192   :  { %142 = vadd.xlane.f32.xlu1 %v141_v33 }
 0x205   :  { %v143_v40 = vpop.xlane.xlu1 %142 }
 0x206   :  { %298 = vrcp.f32 %v143_v40  ;;  %v155_v44 = vand.u32 2147483648, %v143_v40  ;;  %v153_v46 = vand.u32 2147483647, %v143_v40  ;;  %vm149_vm6 = vweird.f32 %v143_v40 }
 0x208   :  { %v156_v48 = vor.u32 1.1754944e-38, %v155_v44  ;;  %vm154_vm8 = vcmp.eq.f32.partialorder %v153_v46, 8.507059e+37 }
 0x20c   :  { %v299_v41 = vpop.eup %298 }
 0x20d   :  { %v145_v42 = vmul.f32 %v299_v41, %v143_v40  ;;  %vm150_vm5 = vweird.f32 %v299_v41 }
 0x20e   :  { %vm151_vm7 = vmor %vm149_vm6, %vm150_vm5 }
 0x20f   :  { %v146_v43 = vsub.f32 1.0, %v145_v42 }
 0x211   :  { %v147_v45 = vmul.f32 %v299_v41, %v146_v43 }
 0x213   :  { %v148_v47 = vadd.f32 %v299_v41, %v147_v45 }
 0x215   :  { %v152_v49 = vsel %vm151_vm7, %v299_v41, %v148_v47 }
 0x216   :  { %v157_v50 = vsel %vm154_vm8, %v156_v48, %v152_v49 }
 0x217   :  { %v158_v51 = vmul.f32 %v297_v32, %v157_v50 }
 0x219   :  { %v159_v52 = vperm.slane %v158_v51, 0  ;;  %v166_v53 = vperm.slane %v158_v51, 1 }
 0x21b   :  { %164 = vperm.xlu2 %287, %v159_v52  }
 0x223   :  { %171 = vperm.xlu2 %287, %v166_v53  }
 0x275   :  { %v165_v1 = vpop.permute.xlu2 %164 }
 0x276   :  { %v173_v2 = vmul.f32 %v165_v1, %v374_v4 }
 0x278   :  { %v175_v3 = vsel %vm78_vm0, %v173_v2, 0.0 }
 0x279   :  { %v176_v6 = vrot.slane %v175_v3, 4 }
 0x27b   :  { %v177_v7 = vadd.f32 %v176_v6, %v175_v3 }
 0x27d   :  { %v172_v8 = vpop.permute.xlu2 %171  ;;  %v178_v10 = vrot.slane %v177_v7, 2 }
 0x27e   :  { %v174_v9 = vmul.f32 %v172_v8, %v381_v5  ;;  %v291_v5 = vld [vmem:[%s472_s9] ss:$0 sm:$0xff] }
 0x27f   :  { %v179_v13 = vadd.f32 %v178_v10, %v177_v7 }
 0x280   :  { %v182_v11 = vsel %vm78_vm0, %v174_v9, 0.0 }
 0x281   :  { %v183_v12 = vrot.slane %v182_v11, 4  ;;  %v180_v16 = vrot.slane %v179_v13, 1 }
 0x283   :  { %v184_v14 = vadd.f32 %v183_v12, %v182_v11  ;;  %v181_v19 = vadd.f32 %v180_v16, %v179_v13 }
 0x285   :  { %v185_v15 = vrot.slane %v184_v14, 2 }
 0x287   :  { %v186_v17 = vadd.f32 %v185_v15, %v184_v14 }
 0x289   :  { %v187_v18 = vrot.slane %v186_v17, 1 }
 0x28b   :  { %v188_v20 = vadd.f32 %v187_v18, %v186_v17 }
 0x28d   :  { %v199_v4 = vsel %vm130_vm1, %v188_v20, %v181_v19 }
 0x28e   :  { %284 = vmatmul.msk.f32.vlgmr.msra.gmra.mxu2 %vm78_vm0, %v199_v4 }
 0x311   :  { %v219_v22 = vpop.f32.mrf.mxu2 }
 0x312   :  { %v243_v23 = vadd.f32 %v242_v21, %v219_v22 }
 0x314   :  { %v249_v24 = vadd.f32 %v291_v5, %v243_v23 }
 0x316   :  { %v286_v25 = vmul.f32 -1.442695, %v249_v24 }
 0x318   :  { %300 = vpow2.f32 %v286_v25 }
 0x31e   :  { %v301_v26 = vpop.eup %300 }
 0x31f   :  { %v253_v27 = vadd.f32 1.0, %v301_v26 }
 0x321   :  { %302 = vrcp.f32 %v253_v27  ;;  %v265_v31 = vand.u32 2147483648, %v253_v27  ;;  %v263_v33 = vand.u32 2147483647, %v253_v27  ;;  %vm259_vm10 = vweird.f32 %v253_v27 }
 0x323   :  { %v266_v35 = vor.u32 1.1754944e-38, %v265_v31  ;;  %vm264_vm12 = vcmp.eq.f32.partialorder %v263_v33, 8.507059e+37 }
 0x327   :  { %v303_v28 = vpop.eup %302 }
 0x328   :  { %v255_v29 = vmul.f32 %v303_v28, %v253_v27  ;;  %vm260_vm9 = vweird.f32 %v303_v28 }
 0x329   :  { %vm261_vm11 = vmor %vm259_vm10, %vm260_vm9 }
 0x32a   :  { %v256_v30 = vsub.f32 1.0, %v255_v29 }
 0x32c   :  { %v257_v32 = vmul.f32 %v303_v28, %v256_v30 }
 0x32e   :  { %v258_v34 = vadd.f32 %v303_v28, %v257_v32 }
 0x330   :  { %v262_v36 = vsel %vm261_vm11, %v303_v28, %v258_v34 }
 0x331   :  { %v267_v37 = vsel %vm264_vm12, %v266_v35, %v262_v36 }
 0x332   :  { %v270_v38 = vsub.f32 1.0, %v267_v37  ;;  %v269_v39 = vmul.f32 %v267_v37, %v70_v0 }
 0x334   :  { %v272_v40 = vmul.f32 %v270_v38, %v199_v4 }
 0x336   :  { %v273_v41 = vadd.f32 %v272_v40, %v269_v39 }
 0x338   :  { %v274_v42 = vpack.c.bf16 %v273_v41, %v273_v41 }
 0x33a   :  { %276 = vst.msk [vmem:[%s473_s10] sm:$0x1] %vm275_vm13, %v274_v42 }

</bundles_post_ra>
